<compile_context>
chip_gen: v5e
topology: v5e:2x2
jax: 0.10.0
libtpu: 0.0.40
codegen_flags: <defaults>
</compile_context>

<pallas_src>
import functools

import jax
import jax.numpy as jnp
from jax import lax
from jax.experimental import pallas as pl
from jax.experimental.pallas import tpu as pltpu

_LANE = 128
_NUM_SPLITS = 2                          # leading 'parallel' axis -> 2 TCs on v7x
_TARGET_BLOCK_BYTES = 4 * 1024 * 1024    # real bytes per hidden buffer (x2 buffers)
_VMEM_LIMIT_BYTES = 32 * 1024 * 1024     # explicit scoped-VMEM limit (all gens)


def _fold_factor(n_rows: int, d: int) -> int:
    """Largest g with g*d in {256, 128} (MXU/lane-dense) that divides N, so the
    wrapper reshape of hidden is a free metadata-only op.  Falls back to g=1."""
    for target in (256, 128):
        if target % d == 0:
            g = target // d
            if g >= 1 and n_rows % g == 0:
                return g
    return 1   # correct but lane-padded fallback (odd N or awkward d)


def _choose_rows_blk(n_f: int, gd: int, itemsize: int, g: int,
                     block_rows=None) -> int:
    """Folded rows per grid step; sized against the true padded VMEM footprint."""
    # row_align keeps hidden blocks sublane-aligned AND the matching label slab
    # blocks (samples_blk/128, 128) a multiple of 8 sublanes.
    row_align = max(8, 1024 // g)
    lane_cols = -(-gd // _LANE) * _LANE            # padding-aware lane footprint
    if block_rows is None:
        block_rows = max(row_align, _TARGET_BLOCK_BYTES // (lane_cols * itemsize))
    rows = -(-block_rows // row_align) * row_align
    rows = min(rows, -(-n_f // row_align) * row_align)   # don't exceed the data
    return max(rows, row_align)


def _icloss_kernel(nf_ref, lab_ref, log_ref, h_ref,
                   cov_out, sxy_out, sxx_out, syy_out,
                   cov_acc, sxy_acc, sxx_acc, syy_acc, *, rows_blk):
    """One grid step: stream a (rows_blk, g*d) folded hidden block plus the
    matching centered labels/logits slab; accumulate gram + Pearson partials."""
    k = pl.program_id(1)
    nsteps = pl.num_programs(1)
    # Intended (unclamped) global block index; the hidden index_map clamps the
    # DMA to the last real block and the row mask below zeroes any overshoot.
    b = pl.program_id(0) * nsteps + k

    @pl.when(k == 0)
    def _():   # re-zeroed at the start of each core's sub-stream
        cov_acc[...] = jnp.zeros_like(cov_acc)
        sxy_acc[...] = jnp.zeros_like(sxy_acc)
        sxx_acc[...] = jnp.zeros_like(sxx_acc)
        syy_acc[...] = jnp.zeros_like(syy_acc)

    # --- Pearson partial sums: inputs arrive mean-centered and zero-padded in
    #     the wrapper, so padded samples contribute exactly 0 (no mask needed).
    x = lab_ref[...]
    y = log_ref[...]
    sxy_acc[...] += jnp.sum(x * y, axis=0, keepdims=True)
    sxx_acc[...] += jnp.sum(x * x, axis=0, keepdims=True)
    syy_acc[...] += jnp.sum(y * y, axis=0, keepdims=True)

    # --- Folded gram: mask folded rows >= n_f (ragged last block and the fully
    #     out-of-range duplicate block), then h_blk.T @ h_blk on the MXU in the
    #     hidden's native dtype with an f32 accumulator.
    ridx = b * rows_blk + lax.broadcasted_iota(jnp.int32, (rows_blk, 1), 0)
    h = jnp.where(ridx < nf_ref[0], h_ref[...], 0)
    cov_acc[...] += lax.dot_general(
        h, h, (((0,), (0,)), ((), ())), preferred_element_type=jnp.float32)

    @pl.when(k == nsteps - 1)
    def _():   # per-core partials; combined in the tiny JAX epilogue
        cov_out[0] = cov_acc[...]
        sxy_out[0] = sxy_acc[...]
        sxx_out[0] = sxx_acc[...]
        syy_out[0] = syy_acc[...]


@functools.partial(jax.jit, static_argnames=("g", "rows_blk"))
def _ic_loss_device(lab, logi, hidden, eps, coef, *, g, rows_blk):
    n = lab.shape[0]
    d = hidden.shape[1]
    gd = g * d
    n_f = hidden.shape[0] // g
    h_fold = hidden.reshape(n_f, gd)          # free: contiguous and N % g == 0

    total_blocks = -(-n_f // rows_blk)
    steps = -(-total_blocks // _NUM_SPLITS)
    hmax = total_blocks - 1
    samples_blk = rows_blk * g                # original samples per grid step
    lab_rows = samples_blk // _LANE           # multiple of 8 by construction
    n_cover = _NUM_SPLITS * steps * samples_blk

    # Two-pass centering of the tiny label/logit vectors (exactly the reference
    # algorithm); centering + pad + reshape fuse into one XLA op here.
    labf = lab.astype(jnp.float32)
    logf = logi.astype(jnp.float32)
    lab_c = jnp.pad(labf - jnp.mean(labf), (0, n_cover - n)).reshape(
        n_cover // _LANE, _LANE)
    log_c = jnp.pad(logf - jnp.mean(logf), (0, n_cover - n)).reshape(
        n_cover // _LANE, _LANE)

    nf_smem = jnp.array([n_f], dtype=jnp.int32)   # scalar-prefetched row bound

    kernel = functools.partial(_icloss_kernel, rows_blk=rows_blk)
    cov_p, sxy_p, sxx_p, syy_p = pl.pallas_call(
        kernel,
        out_shape=(
            jax.ShapeDtypeStruct((_NUM_SPLITS, gd, gd), jnp.float32),
            jax.ShapeDtypeStruct((_NUM_SPLITS, 1, _LANE), jnp.float32),
            jax.ShapeDtypeStruct((_NUM_SPLITS, 1, _LANE), jnp.float32),
            jax.ShapeDtypeStruct((_NUM_SPLITS, 1, _LANE), jnp.float32),
        ),
        grid_spec=pltpu.PrefetchScalarGridSpec(
            num_scalar_prefetch=1,
            grid=(_NUM_SPLITS, steps),
            in_specs=[
                pl.BlockSpec((lab_rows, _LANE),
                             lambda c, k, nf: (c * steps + k, 0)),
                pl.BlockSpec((lab_rows, _LANE),
                             lambda c, k, nf: (c * steps + k, 0)),
                # hidden is NOT padded: clamp the DMA to the last real block;
                # the in-kernel row mask zeroes the overshoot.
                pl.BlockSpec((rows_blk, gd),
                             lambda c, k, nf: (jnp.minimum(c * steps + k, hmax), 0)),
            ],
            out_specs=(
                pl.BlockSpec((1, gd, gd), lambda c, k, nf: (c, 0, 0)),
                pl.BlockSpec((1, 1, _LANE), lambda c, k, nf: (c, 0, 0)),
                pl.BlockSpec((1, 1, _LANE), lambda c, k, nf: (c, 0, 0)),
                pl.BlockSpec((1, 1, _LANE), lambda c, k, nf: (c, 0, 0)),
            ),
            scratch_shapes=[
                pltpu.VMEM((gd, gd), jnp.float32),     # folded-gram accumulator
                pltpu.VMEM((1, _LANE), jnp.float32),   # Σ a·b (lane partials)
                pltpu.VMEM((1, _LANE), jnp.float32),   # Σ a²
                pltpu.VMEM((1, _LANE), jnp.float32),   # Σ b²
            ],
        ),
        compiler_params=pltpu.CompilerParams(
            dimension_semantics=("parallel", "arbitrary"),
            vmem_limit_bytes=_VMEM_LIMIT_BYTES),
    )(nf_smem, lab_c, log_c, h_fold)

    # ---- tiny epilogue (O(d^2)) -------------------------------------------
    cov_fold = jnp.sum(cov_p, axis=0)                            # combine cores
    cov = jnp.einsum("aiaj->ij", cov_fold.reshape(g, d, g, d))   # Σ diag blocks
    std = jnp.sqrt(jnp.diag(cov))                                # = sqrt(Σ h_i²)
    corr = jnp.nan_to_num(cov / (std[:, None] * std[None, :] + eps))
    npairs = (d - 1) * d / 2
    l2 = jnp.sum(jnp.triu(corr, 1) ** 2) / npairs * coef

    sab = jnp.sum(sxy_p)
    saa = jnp.sum(sxx_p)
    sbb = jnp.sum(syy_p)
    l1 = -(sab / jnp.maximum(jnp.sqrt(saa) * jnp.sqrt(sbb), eps))
    return l1 + l2, l1, l2


def ic_loss(labels, logits, hidden=None, *, dim=0, eps=1e-8, coef=0.1,
            block_rows=None):
    """Mirrors ICLoss.forward.  `dim` must be 0 (vector cosine after squeeze)."""
    if labels is None or logits is None:
        return None, None
    lab = jnp.squeeze(labels)
    logi = jnp.squeeze(logits)
    if lab.ndim == 0 or int(lab.shape[0]) <= 100:    # len(labels.squeeze()) gate
        return None, None
    if dim != 0:
        # TODO(synk): only dim=0 (vector cosine) is implemented, matching the
        # module's post-squeeze usage; other dims would need a different grid.
        raise NotImplementedError("ic_loss supports dim=0 only")
    if hidden is None:
        # The torch module would also fail here (None.T); fail loudly instead.
        raise ValueError("ic_loss: hidden is required once len(labels) > 100")
    assert hidden.ndim == 2 and hidden.shape[0] == lab.shape[0], (
        "hidden must be (N, D) with N matching labels")

    n = int(lab.shape[0])
    d = int(hidden.shape[1])
    g = _fold_factor(n, d)
    rows_blk = _choose_rows_blk(n // g, g * d,
                                jnp.dtype(hidden.dtype).itemsize, g, block_rows)

    L, l1, l2 = _ic_loss_device(lab, logi, hidden, eps, coef,
                                g=g, rows_blk=rows_blk)
    # Single host sync for the metric dict (mirrors .item() in the torch code).
    l1_f, l2_f = (float(v) for v in jax.device_get((l1, l2)))
    metric = {"loss": l1_f + l2_f, "-ic": l1_f, "corr": l2_f}
    return L, metric


def _ic_loss_ref(labels, logits, hidden, eps=1e-8, coef=0.1):
    """Pure-JAX reference for correctness checking."""
    lab = jnp.squeeze(labels).astype(jnp.float32)
    logi = jnp.squeeze(logits).astype(jnp.float32)
    a = lab - lab.mean()
    b = logi - logi.mean()
    cos = jnp.sum(a * b) / jnp.maximum(
        jnp.sqrt(jnp.sum(a * a)) * jnp.sqrt(jnp.sum(b * b)), eps)
    l1 = -cos
    h = hidden.astype(jnp.float32)
    cov = jnp.dot(h.T, h, precision=lax.Precision.HIGHEST)
    std = jnp.sqrt(jnp.sum(h ** 2, axis=0, keepdims=True))
    corr = cov / (std.T * std + eps)
    corr = jnp.nan_to_num(corr)
    d = corr.shape[0]
    nn_ = (d - 1) * d / 2
    l2 = jnp.sum(jnp.triu(corr, 1) ** 2) / nn_ * coef
    return l1 + l2, l1, l2


if __name__ == "__main__":
    key = jax.random.PRNGKey(0)
    k1, k2, k3 = jax.random.split(key, 3)

    # N > 100 required by the module; N=2500, d=32 -> fold g=4 (2500 % 8 != 0),
    # and block_rows=128 (rounded to 256) forces a multi-step streamed grid with
    # a ragged last block plus the masked duplicate block on the 2-way split.
    N, D = 2500, 32
    labels = jax.random.normal(k1, (N, 1), jnp.float32)
    logits = jax.random.normal(k2, (N, 1), jnp.float32)
    hidden = jax.random.normal(k3, (N, D), jnp.float32)

    L, metric = ic_loss(labels, logits, hidden, block_rows=128)
    L = jax.block_until_ready(L)
    L_ref, l1_ref, l2_ref = _ic_loss_ref(labels, logits, hidden)
    assert jnp.allclose(L, L_ref, rtol=1e-4, atol=1e-5), (L, L_ref)
    assert abs(metric["-ic"] - float(l1_ref)) < 5e-5
    assert abs(metric["corr"] - float(l2_ref)) < 5e-5

    # Default tile-sizing path + bf16 hidden pass-through (native MXU dtype).
    hidden_bf16 = hidden.astype(jnp.bfloat16)
    L_b, metric_b = ic_loss(labels, logits, hidden_bf16)
    L_b = jax.block_until_ready(L_b)
    L_ref_b, _, _ = _ic_loss_ref(labels, logits, hidden_bf16.astype(jnp.float32))
    assert jnp.allclose(L_b, L_ref_b, rtol=1e-2, atol=1e-3), (L_b, L_ref_b)

    # Odd N -> fold divisibility fails -> unfolded (g=1) fallback, in-kernel
    # tail masking on the un-padded hidden array.
    N2 = 2501
    lab2 = jax.random.normal(k1, (N2,), jnp.float32)
    log2 = jax.random.normal(k2, (N2,), jnp.float32)
    hid2 = jax.random.normal(k3, (N2, D), jnp.float32)
    L2v, m2 = ic_loss(lab2, log2, hid2, block_rows=256)
    L2v = jax.block_until_ready(L2v)
    L2_ref, _, _ = _ic_loss_ref(lab2, log2, hid2)
    assert jnp.allclose(L2v, L2_ref, rtol=1e-4, atol=1e-5), (L2v, L2_ref)

    # Gate behaviors (None inputs / short sequences) handled in the wrapper.
    assert ic_loss(None, logits, hidden) == (None, None)
    assert ic_loss(labels[:50], logits[:50], hidden[:50]) == (None, None)

    print("KERNEL_OK")
</pallas_src>

<mosaic_0001>
module attributes {stable_mosaic.version = 11 : i64} {
  func.func @_icloss_kernel(%arg0: i32, %arg1: i32, %arg2: memref<1xi32, #tpu.memory_space<smem>>, %arg3: memref<8x128xf32, #tpu.memory_space<vmem>>, %arg4: memref<8x128xf32, #tpu.memory_space<vmem>>, %arg5: memref<256x128xf32, #tpu.memory_space<vmem>>, %arg6: memref<1x128x128xf32, #tpu.memory_space<vmem>>, %arg7: memref<1x1x128xf32, #tpu.memory_space<vmem>>, %arg8: memref<1x1x128xf32, #tpu.memory_space<vmem>>, %arg9: memref<1x1x128xf32, #tpu.memory_space<vmem>>, %arg10: memref<128x128xf32, #tpu.memory_space<vmem>>, %arg11: memref<1x128xf32, #tpu.memory_space<vmem>>, %arg12: memref<1x128xf32, #tpu.memory_space<vmem>>, %arg13: memref<1x128xf32, #tpu.memory_space<vmem>>) attributes {dimension_semantics = [#tpu.dimension_semantics<parallel>, #tpu.dimension_semantics<arbitrary>], iteration_bounds = array<i64: 2, 2>, scalar_prefetch = 1 : i64, scratch_operands = 4 : i64, tpu.core_type = #tpu.core_type<tc>, window_params = [{transform_indices = @transform_0, window_bounds = array<i64: 8, 128>}, {transform_indices = @transform_1, window_bounds = array<i64: 8, 128>}, {transform_indices = @transform_2, window_bounds = array<i64: 256, 128>}, {transform_indices = @transform_3, window_bounds = array<i64: 1, 128, 128>}, {transform_indices = @transform_4, window_bounds = array<i64: 1, 1, 128>}, {transform_indices = @transform_5, window_bounds = array<i64: 1, 1, 128>}, {transform_indices = @transform_6, window_bounds = array<i64: 1, 1, 128>}]} {
    %c2_i32 = arith.constant 2 : i32
    %0 = arith.muli %arg0, %c2_i32 : i32
    %1 = arith.addi %0, %arg1 : i32
    %c0_i32 = arith.constant 0 : i32
    %2 = arith.cmpi eq, %arg1, %c0_i32 : i32
    %3 = arith.extui %2 : i1 to i32
    %c0_i32_0 = arith.constant 0 : i32
    %4 = arith.cmpi ne, %3, %c0_i32_0 : i32
    scf.if %4 {
      %cst_28 = arith.constant 0.000000e+00 : f32
      %45 = vector.broadcast %cst_28 : f32 to vector<128x128xf32>
      %c0_29 = arith.constant 0 : index
      %c0_30 = arith.constant 0 : index
      %46 = vector.load %arg10[%c0_29, %c0_30] : memref<128x128xf32, #tpu.memory_space<vmem>>, vector<128x128xf32>
      tpu.vector_store %arg10[%c0_29, %c0_30], %45 {strides = array<i32>} : memref<128x128xf32, #tpu.memory_space<vmem>>, vector<128x128xf32>,
      %cst_31 = arith.constant 0.000000e+00 : f32
      %47 = vector.broadcast %cst_31 : f32 to vector<1x128xf32>
      %c0_32 = arith.constant 0 : index
      %c0_33 = arith.constant 0 : index
      %48 = vector.load %arg11[%c0_32, %c0_33] : memref<1x128xf32, #tpu.memory_space<vmem>>, vector<1x128xf32>
      tpu.vector_store %arg11[%c0_32, %c0_33], %47 {strides = array<i32>} : memref<1x128xf32, #tpu.memory_space<vmem>>, vector<1x128xf32>,
      %cst_34 = arith.constant 0.000000e+00 : f32
      %49 = vector.broadcast %cst_34 : f32 to vector<1x128xf32>
      %c0_35 = arith.constant 0 : index
      %c0_36 = arith.constant 0 : index
      %50 = vector.load %arg12[%c0_35, %c0_36] : memref<1x128xf32, #tpu.memory_space<vmem>>, vector<1x128xf32>
      tpu.vector_store %arg12[%c0_35, %c0_36], %49 {strides = array<i32>} : memref<1x128xf32, #tpu.memory_space<vmem>>, vector<1x128xf32>,
      %cst_37 = arith.constant 0.000000e+00 : f32
      %51 = vector.broadcast %cst_37 : f32 to vector<1x128xf32>
      %c0_38 = arith.constant 0 : index
      %c0_39 = arith.constant 0 : index
      %52 = vector.load %arg13[%c0_38, %c0_39] : memref<1x128xf32, #tpu.memory_space<vmem>>, vector<1x128xf32>
      tpu.vector_store %arg13[%c0_38, %c0_39], %51 {strides = array<i32>} : memref<1x128xf32, #tpu.memory_space<vmem>>, vector<1x128xf32>,
    } else {
    }
    %c0 = arith.constant 0 : index
    %c0_1 = arith.constant 0 : index
    %5 = vector.load %arg3[%c0, %c0_1] : memref<8x128xf32, #tpu.memory_space<vmem>>, vector<8x128xf32>
    %c0_2 = arith.constant 0 : index
    %c0_3 = arith.constant 0 : index
    %6 = vector.load %arg4[%c0_2, %c0_3] : memref<8x128xf32, #tpu.memory_space<vmem>>, vector<8x128xf32>
    %c0_4 = arith.constant 0 : index
    %c0_5 = arith.constant 0 : index
    %7 = vector.load %arg11[%c0_4, %c0_5] : memref<1x128xf32, #tpu.memory_space<vmem>>, vector<1x128xf32>
    %8 = arith.mulf %5, %6 : vector<8x128xf32>
    %cst = arith.constant dense<0.000000e+00> : vector<128xf32>
    %9 = vector.multi_reduction <add>, %8, %cst [0] : vector<8x128xf32> to vector<128xf32>
    %10 = vector.shape_cast %9 : vector<128xf32> to vector<1x128xf32>
    %11 = arith.addf %7, %10 : vector<1x128xf32>
    %c0_6 = arith.constant 0 : index
    %c0_7 = arith.constant 0 : index
    %12 = vector.load %arg11[%c0_6, %c0_7] : memref<1x128xf32, #tpu.memory_space<vmem>>, vector<1x128xf32>
    tpu.vector_store %arg11[%c0_6, %c0_7], %11 {strides = array<i32>} : memref<1x128xf32, #tpu.memory_space<vmem>>, vector<1x128xf32>,
    %c0_8 = arith.constant 0 : index
    %c0_9 = arith.constant 0 : index
    %13 = vector.load %arg12[%c0_8, %c0_9] : memref<1x128xf32, #tpu.memory_space<vmem>>, vector<1x128xf32>
    %14 = arith.mulf %5, %5 : vector<8x128xf32>
    %cst_10 = arith.constant dense<0.000000e+00> : vector<128xf32>
    %15 = vector.multi_reduction <add>, %14, %cst_10 [0] : vector<8x128xf32> to vector<128xf32>
    %16 = vector.shape_cast %15 : vector<128xf32> to vector<1x128xf32>
    %17 = arith.addf %13, %16 : vector<1x128xf32>
    %c0_11 = arith.constant 0 : index
    %c0_12 = arith.constant 0 : index
    %18 = vector.load %arg12[%c0_11, %c0_12] : memref<1x128xf32, #tpu.memory_space<vmem>>, vector<1x128xf32>
    tpu.vector_store %arg12[%c0_11, %c0_12], %17 {strides = array<i32>} : memref<1x128xf32, #tpu.memory_space<vmem>>, vector<1x128xf32>,
    %c0_13 = arith.constant 0 : index
    %c0_14 = arith.constant 0 : index
    %19 = vector.load %arg13[%c0_13, %c0_14] : memref<1x128xf32, #tpu.memory_space<vmem>>, vector<1x128xf32>
    %20 = arith.mulf %6, %6 : vector<8x128xf32>
    %cst_15 = arith.constant dense<0.000000e+00> : vector<128xf32>
    %21 = vector.multi_reduction <add>, %20, %cst_15 [0] : vector<8x128xf32> to vector<128xf32>
    %22 = vector.shape_cast %21 : vector<128xf32> to vector<1x128xf32>
    %23 = arith.addf %19, %22 : vector<1x128xf32>
    %c0_16 = arith.constant 0 : index
    %c0_17 = arith.constant 0 : index
    %24 = vector.load %arg13[%c0_16, %c0_17] : memref<1x128xf32, #tpu.memory_space<vmem>>, vector<1x128xf32>
    tpu.vector_store %arg13[%c0_16, %c0_17], %23 {strides = array<i32>} : memref<1x128xf32, #tpu.memory_space<vmem>>, vector<1x128xf32>,
    %c256_i32 = arith.constant 256 : i32
    %25 = arith.muli %1, %c256_i32 : i32
    %26 = tpu.iota {dimensions = array<i32: 0>} : vector<256x1xi32>
    %27 = vector.broadcast %25 : i32 to vector<256x1xi32>
    %28 = arith.addi %27, %26 : vector<256x1xi32>
    %c0_18 = arith.constant 0 : index
    %29 = memref.load %arg2[%c0_18] : memref<1xi32, #tpu.memory_space<smem>>
    %30 = vector.broadcast %29 : i32 to vector<256x1xi32>
    %31 = arith.cmpi slt, %28, %30 : vector<256x1xi32>
    %c0_19 = arith.constant 0 : index
    %c0_20 = arith.constant 0 : index
    %32 = vector.load %arg5[%c0_19, %c0_20] : memref<256x128xf32, #tpu.memory_space<vmem>>, vector<256x128xf32>
    %c0_i32_21 = arith.constant 0 : i32
    %33 = arith.sitofp %c0_i32_21 : i32 to f32
    %34 = vector.shape_cast %31 : vector<256x1xi1> to vector<256x1xi1>
    %35 = vector.broadcast %34 : vector<256x1xi1> to vector<256x128xi1>
    %36 = vector.broadcast %33 : f32 to vector<256x128xf32>
    %37 = arith.select %35, %32, %36 : vector<256x128xi1>, vector<256x128xf32>
    %c0_22 = arith.constant 0 : index
    %c0_23 = arith.constant 0 : index
    %38 = vector.load %arg10[%c0_22, %c0_23] : memref<128x128xf32, #tpu.memory_space<vmem>>, vector<128x128xf32>
    %cst_24 = arith.constant dense<0.000000e+00> : vector<128x128xf32>
    %39 = tpu.matmul %37, %37, %cst_24 {dimension_numbers = #tpu.dot_dimension_numbers<[0], [0], [1], [1], [0, 1, 1, 1], [], []>} : vector<256x128xf32>, vector<256x128xf32>, vector<128x128xf32> -> vector<128x128xf32>
    %40 = arith.addf %38, %39 : vector<128x128xf32>
    %c0_25 = arith.constant 0 : index
    %c0_26 = arith.constant 0 : index
    %41 = vector.load %arg10[%c0_25, %c0_26] : memref<128x128xf32, #tpu.memory_space<vmem>>, vector<128x128xf32>
    tpu.vector_store %arg10[%c0_25, %c0_26], %40 {strides = array<i32>} : memref<128x128xf32, #tpu.memory_space<vmem>>, vector<128x128xf32>,
    %c1_i32 = arith.constant 1 : i32
    %42 = arith.cmpi eq, %arg1, %c1_i32 : i32
    %43 = arith.extui %42 : i1 to i32
    %c0_i32_27 = arith.constant 0 : i32
    %44 = arith.cmpi ne, %43, %c0_i32_27 : i32
    scf.if %44 {
      %c0_28 = arith.constant 0 : index
      %c0_29 = arith.constant 0 : index
      %45 = vector.load %arg10[%c0_28, %c0_29] : memref<128x128xf32, #tpu.memory_space<vmem>>, vector<128x128xf32>
      %c0_30 = arith.constant 0 : index
      %c0_31 = arith.constant 0 : index
      %c0_32 = arith.constant 0 : index
      %46 = vector.load %arg6[%c0_30, %c0_31, %c0_32] : memref<1x128x128xf32, #tpu.memory_space<vmem>>, vector<1x128x128xf32>
      %47 = vector.shape_cast %46 : vector<1x128x128xf32> to vector<128x128xf32>
      %48 = vector.shape_cast %45 : vector<128x128xf32> to vector<1x128x128xf32>
      tpu.vector_store %arg6[%c0_30, %c0_31, %c0_32], %48 {strides = array<i32>} : memref<1x128x128xf32, #tpu.memory_space<vmem>>, vector<1x128x128xf32>,
      %c0_33 = arith.constant 0 : index
      %c0_34 = arith.constant 0 : index
      %49 = vector.load %arg11[%c0_33, %c0_34] : memref<1x128xf32, #tpu.memory_space<vmem>>, vector<1x128xf32>
      %c0_35 = arith.constant 0 : index
      %c0_36 = arith.constant 0 : index
      %c0_37 = arith.constant 0 : index
      %50 = vector.load %arg7[%c0_35, %c0_36, %c0_37] : memref<1x1x128xf32, #tpu.memory_space<vmem>>, vector<1x1x128xf32>
      %51 = vector.shape_cast %50 : vector<1x1x128xf32> to vector<1x128xf32>
      %52 = vector.shape_cast %49 : vector<1x128xf32> to vector<1x1x128xf32>
      tpu.vector_store %arg7[%c0_35, %c0_36, %c0_37], %52 {strides = array<i32>} : memref<1x1x128xf32, #tpu.memory_space<vmem>>, vector<1x1x128xf32>,
      %c0_38 = arith.constant 0 : index
      %c0_39 = arith.constant 0 : index
      %53 = vector.load %arg12[%c0_38, %c0_39] : memref<1x128xf32, #tpu.memory_space<vmem>>, vector<1x128xf32>
      %c0_40 = arith.constant 0 : index
      %c0_41 = arith.constant 0 : index
      %c0_42 = arith.constant 0 : index
      %54 = vector.load %arg8[%c0_40, %c0_41, %c0_42] : memref<1x1x128xf32, #tpu.memory_space<vmem>>, vector<1x1x128xf32>
      %55 = vector.shape_cast %54 : vector<1x1x128xf32> to vector<1x128xf32>
      %56 = vector.shape_cast %53 : vector<1x128xf32> to vector<1x1x128xf32>
      tpu.vector_store %arg8[%c0_40, %c0_41, %c0_42], %56 {strides = array<i32>} : memref<1x1x128xf32, #tpu.memory_space<vmem>>, vector<1x1x128xf32>,
      %c0_43 = arith.constant 0 : index
      %c0_44 = arith.constant 0 : index
      %57 = vector.load %arg13[%c0_43, %c0_44] : memref<1x128xf32, #tpu.memory_space<vmem>>, vector<1x128xf32>
      %c0_45 = arith.constant 0 : index
      %c0_46 = arith.constant 0 : index
      %c0_47 = arith.constant 0 : index
      %58 = vector.load %arg9[%c0_45, %c0_46, %c0_47] : memref<1x1x128xf32, #tpu.memory_space<vmem>>, vector<1x1x128xf32>
      %59 = vector.shape_cast %58 : vector<1x1x128xf32> to vector<1x128xf32>
      %60 = vector.shape_cast %57 : vector<1x128xf32> to vector<1x1x128xf32>
      tpu.vector_store %arg9[%c0_45, %c0_46, %c0_47], %60 {strides = array<i32>} : memref<1x1x128xf32, #tpu.memory_space<vmem>>, vector<1x1x128xf32>,
    } else {
    }
    return
  }
  func.func @transform_0(%arg0: i32, %arg1: i32, %arg2: memref<1xi32, #tpu.memory_space<smem>>) -> (i32, i32) {
    %c2_i32 = arith.constant 2 : i32
    %0 = arith.muli %arg0, %c2_i32 : i32
    %1 = arith.addi %0, %arg1 : i32
    %c0_i32 = arith.constant 0 : i32
    %c0_i32_0 = arith.constant 0 : i32
    return %1, %c0_i32 : i32, i32
  }
  func.func @transform_1(%arg0: i32, %arg1: i32, %arg2: memref<1xi32, #tpu.memory_space<smem>>) -> (i32, i32) {
    %c2_i32 = arith.constant 2 : i32
    %0 = arith.muli %arg0, %c2_i32 : i32
    %1 = arith.addi %0, %arg1 : i32
    %c0_i32 = arith.constant 0 : i32
    %c0_i32_0 = arith.constant 0 : i32
    return %1, %c0_i32 : i32, i32
  }
  func.func @transform_2(%arg0: i32, %arg1: i32, %arg2: memref<1xi32, #tpu.memory_space<smem>>) -> (i32, i32) {
    %c2_i32 = arith.constant 2 : i32
    %0 = arith.muli %arg0, %c2_i32 : i32
    %1 = arith.addi %0, %arg1 : i32
    %c2_i32_0 = arith.constant 2 : i32
    %2 = arith.minsi %1, %c2_i32_0 : i32
    %c0_i32 = arith.constant 0 : i32
    %c0_i32_1 = arith.constant 0 : i32
    return %2, %c0_i32 : i32, i32
  }
  func.func @transform_3(%arg0: i32, %arg1: i32, %arg2: memref<1xi32, #tpu.memory_space<smem>>) -> (i32, i32, i32) {
    %c0_i32 = arith.constant 0 : i32
    %c0_i32_0 = arith.constant 0 : i32
    %c0_i32_1 = arith.constant 0 : i32
    return %arg0, %c0_i32, %c0_i32_0 : i32, i32, i32
  }
  func.func @transform_4(%arg0: i32, %arg1: i32, %arg2: memref<1xi32, #tpu.memory_space<smem>>) -> (i32, i32, i32) {
    %c0_i32 = arith.constant 0 : i32
    %c0_i32_0 = arith.constant 0 : i32
    %c0_i32_1 = arith.constant 0 : i32
    return %arg0, %c0_i32, %c0_i32_0 : i32, i32, i32
  }
  func.func @transform_5(%arg0: i32, %arg1: i32, %arg2: memref<1xi32, #tpu.memory_space<smem>>) -> (i32, i32, i32) {
    %c0_i32 = arith.constant 0 : i32
    %c0_i32_0 = arith.constant 0 : i32
    %c0_i32_1 = arith.constant 0 : i32
    return %arg0, %c0_i32, %c0_i32_0 : i32, i32, i32
  }
  func.func @transform_6(%arg0: i32, %arg1: i32, %arg2: memref<1xi32, #tpu.memory_space<smem>>) -> (i32, i32, i32) {
    %c0_i32 = arith.constant 0 : i32
    %c0_i32_0 = arith.constant 0 : i32
    %c0_i32_1 = arith.constant 0 : i32
    return %arg0, %c0_i32, %c0_i32_0 : i32, i32, i32
  }
}

</mosaic_0001>

<bundles_post_ra>
// kernel: _ic_loss_device.1
= control target key start
LH: loop header
LB: loop body
LE: loop exit
PB: predicated region body
PF: predicated region fallthrough
CT: control target
= control target key end

     0   :  { %s1466_s26 = smov 0   ;;  %s1468_s27 = smov 0   ;;  %s2225_s0 = inlined_call_operand.<no memory space> [shape: s32[1], index: 0, kind: input, shape index: {}]   ;;  %s2226_s1 = inlined_call_operand.vmem [shape: f32[32,128], index: 1, kind: input, shape index: {}]   ;;  %s2227_s2 = inlined_call_operand.vmem [shape: f32[32,128], index: 2, kind: input, shape index: {}]   ;;  %s2228_s3 = inlined_call_operand.vmem [shape: f32[625,128], index: 3, kind: input, shape index: {}]   ;;  %s2229_s4 = inlined_call_operand.vmem [shape: f32[2,128,128], index: 4, kind: output, shape index: {0}]   ;;  %s2230_s5 = inlined_call_operand.vmem [shape: f32[2,1,128], index: 5, kind: output, shape index: {1}]   ;;  %s2231_s6 = inlined_call_operand.vmem [shape: f32[2,1,128], index: 6, kind: output, shape index: {2}]   ;;  %s2232_s7 = inlined_call_operand.vmem [shape: f32[2,1,128], index: 7, kind: output, shape index: {3}]  }
   0x1   :  { %2271 = sst [smem:[#allocation23_spill]] %s2226_s1  ;;  %s1470_s28 = smov 0  }
   0x2   :  { %13 = sst [smem:[#allocation7]] %s2225_s0  ;;  %s1472_s29 = smov 0  }
   0x3   :  { %s1474_s30 = smov 0  }
   0x4 LB: > { %s28_s0 = sadd.s32 1, %s1412_s28  ;;  %s31_s8 = sadd.s32 1, %s1416_s29  ;;  %s1420_s30 = sphi %s1474_s30, %s19_s30   ;;  %s1416_s29 = sphi %s1472_s29, %s2337_s29   ;;  %s1412_s28 = sphi %s1470_s28, %s2336_s28   ;;  %s1408_s27 = sphi %s1468_s27, %s2335_s27   ;;  %s1404_s26 = sphi %s1466_s26, %s2334_s26  }
   0x5   : > { %p29_p0 = scmp.ge.s32.totalorder %s28_s0, 2  ;;  %p1148_p1 = scmp.ge.s32.totalorder %s1420_s30, 1 }
   0x6   : > { %p292_p2 = scmp.lt.s32.totalorder %s1420_s30, 5 }
   0x7   : > { %s2339_s0 = smov (%p29_p0, %s28_s0), 0  ;;  %s2341_s8 = smov (!%p29_p0, %s31_s8), %s1416_s29 }
   0x8   : > { %2272 = sst [smem:[#allocation8_spill]] %s2339_s0  ;;  %p293_p3 = pnand %p1148_p1, %p292_p2 }
   0x9   : > { %p33_p4 = scmp.ge.s32.totalorder %s2341_s8, 2 }
   0xa   : > { %296 = sbr.rel (%p293_p3) target bundleno = 507 (0x1fb), region = 32 }
   0xb   : > { %s2343_s8 = smov (%p33_p4, %s2341_s8), 0 }
   0xc   : > { %2273 = sst [smem:[#allocation9_spill]] %s2343_s8 }
   0xf   : > { %s1149_s9 = sshll.u32 %s1408_s27, 1  ;;  %p389_p5 = scmp.lt.s32.totalorder %s1408_s27, 1 }
  0x10   : > { %s1499_s10 = sadd.s32 %s1404_s26, %s1149_s9  ;;  %s2274_s1 = sld [smem:[#allocation23_spill]] }
  0x11   : > { %p353_p6 = scmp.lt.s32.totalorder %s1499_s10, 3  ;;  %p369_p7 = scmp.lt.s32.totalorder %s1499_s10, 2 }
  0x12   : > { %s2345_s27 = smov (!%p389_p5, %s1408_s27), 1  ;;  %p1159_p9 = scmp.ne.s32.totalorder %s1404_s26, 0 }
  0x13   : > { %s354_s11 = scalar_select %p353_p6, %s1499_s10, 3 }
  0x14   : > { %s370_s12 = scalar_select %p369_p7, %s1499_s10, 2 }
  0x15   : > { %s1150_s13 = sshll.u32 %s354_s11, 3  ;;  %s1196_s14 = sshll.u32 %s2345_s27, 7 }
  0x16   : > { %s1511_s17 = scalar_lea.vmem %s2274_s1, %s1150_s13  ;;  %s1516_s20 = scalar_lea.vmem %s2227_s2, %s1150_s13 }
  0x17   : > { %s1154_s21 = sshll.u32 %s370_s12, 5  ;;  %s1521_s24 = scalar_lea.vmem %s2229_s4, %s1196_s14 }
  0x18   : > { %p376_p8 = scmp.lt.s32.totalorder %s1154_s21, 78  ;;  %s396_s11 = scalar_lea.vmem %s2230_s5, %s2345_s27 }
  0x19   : > { %s399_s16 = scalar_lea.vmem %s2231_s6, %s2345_s27  ;;  %s402_s13 = scalar_lea.vmem %s2232_s7, %s2345_s27 }
  0x1a   : > { %s2347_s21 = smov (!%p376_p8, %s1154_s21), 78  ;;  %408 = sbr.rel (%p1159_p9) target bundleno = 51 (0x33), region = 36 }
  0x1b   : > { %s1155_s12 = sshll.u32 %s2347_s21, 3 }
  0x1c   : > { %s1538_s14 = scalar_lea.vmem %s2228_s3, %s1155_s12 }
  0x1f   : > { %v1422_v0 = vmov 0.0  }
  0x20   : > { %409 = vst [vmem:[#allocation2 + $0x30] sm:$0xff] %v1422_v0 }
  0x21   : > { %410 = vst [vmem:[#allocation2] sm:$0xff] %v1422_v0 }
  0x22   : > { %411 = vst [vmem:[#allocation2 + $0x58] sm:$0xff] %v1422_v0 }
  0x23   : > { %412 = vst [vmem:[#allocation2 + $0x18] sm:$0xff] %v1422_v0 }
  0x24   : > { %413 = vst [vmem:[#allocation2 + $0x50] sm:$0xff] %v1422_v0 }
  0x25   : > { %414 = vst [vmem:[#allocation2 + $0x68] sm:$0xff] %v1422_v0 }
  0x26   : > { %415 = vst [vmem:[#allocation2 + $0x8] sm:$0xff] %v1422_v0 }
  0x27   : > { %416 = vst [vmem:[#allocation2 + $0x48] sm:$0xff] %v1422_v0 }
  0x28   : > { %417 = vst [vmem:[#allocation2 + $0x40] sm:$0xff] %v1422_v0 }
  0x29   : > { %418 = vst [vmem:[#allocation2 + $0x20] sm:$0xff] %v1422_v0 }
  0x2a   : > { %419 = vst [vmem:[#allocation2 + $0x10] sm:$0xff] %v1422_v0 }
  0x2b   : > { %420 = vst [vmem:[#allocation2 + $0x38] sm:$0xff] %v1422_v0 }
  0x2c   : > { %421 = vst [vmem:[#allocation2 + $0x60] sm:$0xff] %v1422_v0 }
  0x2d   : > { %422 = vst [vmem:[#allocation2 + $0x70] sm:$0xff] %v1422_v0 }
  0x2e   : > { %423 = vst [vmem:[#allocation2 + $0x78] sm:$0xff] %v1422_v0 }
  0x2f   : > { %424 = vst [vmem:[#allocation2 + $0x28] sm:$0xff] %v1422_v0 }
  0x30   : > { %425 = vst [vmem:[#allocation3] sm:$0x1] %v1422_v0 }
  0x31   : > { %426 = vst [vmem:[#allocation4] sm:$0x1] %v1422_v0 }
  0x32   : > { %427 = vst [vmem:[#allocation5] sm:$0x1] %v1422_v0 }
  0x33 PF: > { %s1160_s1 = sshll.u32 %s1499_s10, 8  ;;  %v461_v1 = vlaneseq  ;;  %s527_s0 = sld [smem:[#allocation7]]  ;;  %v1554_v8 = vld [vmem:[%s1538_s14] sm:$0xff]  ;;  %v1588_v18 = vld [vmem:[%s1538_s14 + $0x8] sm:$0xff]  ;;  %v1613_v26 = vld [vmem:[%s1538_s14 + $0x10] sm:$0xff] }
  0x34   : > { %v1542_v2 = vstv %s1160_s1  ;;  %2276 = vst [vmem:[#allocation11_spill] sm:$0xff] %v1554_v8  ;;  %v1562_v11 = vld [vmem:[%s1538_s14 + $0x80] sm:$0xff]  ;;  %v1591_v19 = vld [vmem:[%s1538_s14 + $0x88] sm:$0xff]  ;;  %v1616_v27 = vld [vmem:[%s1538_s14 + $0x90] sm:$0xff]  ;;  %p1193_p10 = scmp.ne.s32.totalorder %s1404_s26, 1 }
  0x35   : > { %v1544_v3 = vshrl.u32 %v461_v1, 7  ;;  %2278 = vst [vmem:[#allocation13_spill] sm:$0xff] %v1562_v11  ;;  %v1639_v35 = vld [vmem:[%s1538_s14 + $0x18] sm:$0xff]  ;;  %v1665_v44 = vld [vmem:[%s1538_s14 + $0x20] sm:$0xff]  ;;  %v1691_v53 = vld [vmem:[%s1538_s14 + $0x28] sm:$0xff] }
  0x36   : > { %2281 = vst [vmem:[#allocation16_spill] sm:$0xff] %v1588_v18  ;;  %v1642_v36 = vld [vmem:[%s1538_s14 + $0x98] sm:$0xff]  ;;  %v1668_v45 = vld [vmem:[%s1538_s14 + $0xa0] sm:$0xff]  ;;  %v1694_v54 = vld [vmem:[%s1538_s14 + $0xa8] sm:$0xff] }
  0x37   : > { %v478_v4 = vadd.s32 128, %v1544_v3  ;;  %v1549_v5 = vadd.s32 %v1542_v2, %v1544_v3  ;;  %v463_v6 = vadd.s32 8, %v1544_v3  ;;  %v479_v7 = vadd.s32 136, %v1544_v3  ;;  %2282 = vst [vmem:[#allocation17_spill] sm:$0xff] %v1591_v19  ;;  %v1717_v62 = vld [vmem:[%s1538_s14 + $0x30] sm:$0xff] }
  0x38   : > { %v464_v16 = vadd.s32 16, %v1544_v3  ;;  %v480_v20 = vadd.s32 144, %v1544_v3  ;;  %v465_v28 = vadd.s32 24, %v1544_v3  ;;  %v481_v29 = vadd.s32 152, %v1544_v3  ;;  %v1720_v63 = vld [vmem:[%s1538_s14 + $0xb0] sm:$0xff] }
  0x39   : > { %2275 = vst [vmem:[#allocation10_spill] sm:$0xff] %v1549_v5  ;;  %v1557_v9 = vadd.s32 %v1542_v2, %v478_v4  ;;  %v1559_v10 = vstv %s527_s0  ;;  %v1565_v12 = vadd.s32 %v1542_v2, %v463_v6  ;;  %v1568_v13 = vadd.s32 %v1542_v2, %v479_v7 }
  0x3a   : > { %vm2234_vm0 = vcmp.lt.s32.totalorder %v1549_v5, %v1559_v10  ;;  %v1603_v23 = vadd.s32 %v1542_v2, %v464_v16  ;;  %v1606_v24 = vadd.s32 %v1542_v2, %v480_v20  ;;  %v1629_v32 = vadd.s32 %v1542_v2, %v465_v28  ;;  %v1743_v16 = vld [vmem:[%s1538_s14 + $0x38] sm:$0xff] }
  0x3b   : > { %2277 = vst [vmem:[#allocation12_spill] sm:$0xff] %v1557_v9  ;;  %vm2233_vm1 = vcmp.lt.s32.totalorder %v1557_v9, %v1559_v10  ;;  %v657_v14 = vsel %vm2234_vm0, %v1554_v8, 0.0  ;;  %vm2236_vm2 = vcmp.lt.s32.totalorder %v1565_v12, %v1559_v10  ;;  %vm2235_vm3 = vcmp.lt.s32.totalorder %v1568_v13, %v1559_v10 }
  0x3c   : > { %2279 = vst [vmem:[#allocation14_spill] sm:$0xff] %v1565_v12  ;;  %v673_v15 = vsel %vm2233_vm1, %v1562_v11, 0.0  ;;  %v658_v21 = vsel %vm2236_vm2, %v1588_v18, 0.0  ;;  %v674_v22 = vsel %vm2235_vm3, %v1591_v19, 0.0  ;;  %vm2238_vm4 = vcmp.lt.s32.totalorder %v1603_v23, %v1559_v10 }
  0x3d   : > { %2280 = vst [vmem:[#allocation15_spill] sm:$0xff] %v1568_v13  ;;  %v1270_v17 = vpack.i.bf16 %v673_v15, %v657_v14  ;;  %v1272_v25 = vpack.i.bf16 %v674_v22, %v658_v21  ;;  %vm2237_vm5 = vcmp.lt.s32.totalorder %v1606_v24, %v1559_v10  ;;  %v659_v30 = vsel %vm2238_vm4, %v1613_v26, 0.0  ;;  %v429_v13 = vld [vmem:[%s1516_s20] sm:$0xff] }
  0x3e   : > { %2283 = vst [vmem:[#allocation18_spill] sm:$0xff] %v1606_v24  ;;  %v675_v31 = vsel %vm2237_vm5, %v1616_v27, 0.0  ;;  %v1632_v33 = vadd.s32 %v1542_v2, %v481_v29  ;;  %vm2240_vm6 = vcmp.lt.s32.totalorder %v1629_v32, %v1559_v10  ;;  %v466_v37 = vadd.s32 32, %v1544_v3 }
  0x3f   : > { %1271 = vxpose.xlu0.b32.start [1/16] %v1270_v17, 128  ;;  %v1274_v34 = vpack.i.bf16 %v675_v31, %v659_v30  ;;  %v482_v38 = vadd.s32 160, %v1544_v3  ;;  %v660_v39 = vsel %vm2240_vm6, %v1639_v35, 0.0  ;;  %v467_v46 = vadd.s32 40, %v1544_v3  ;;  %v1746_v17 = vld [vmem:[%s1538_s14 + $0xb8] sm:$0xff]  ;;  %v1769_v31 = vld [vmem:[%s1538_s14 + $0x40] sm:$0xff] }
  0x40   : > { %vm2239_vm7 = vcmp.lt.s32.totalorder %v1632_v33, %v1559_v10  ;;  %v1655_v41 = vadd.s32 %v1542_v2, %v466_v37  ;;  %v483_v47 = vadd.s32 168, %v1544_v3  ;;  %v468_v55 = vadd.s32 48, %v1544_v3 }
  0x41   : > { %v676_v40 = vsel %vm2239_vm7, %v1642_v36, 0.0  ;;  %v1658_v42 = vadd.s32 %v1542_v2, %v482_v38  ;;  %v1681_v50 = vadd.s32 %v1542_v2, %v467_v46  ;;  %v484_v56 = vadd.s32 176, %v1544_v3 }
  0x42   : > { %v1276_v43 = vpack.i.bf16 %v676_v40, %v660_v39  ;;  %vm2250_vm8 = vcmp.lt.s32.totalorder %v1655_v41, %v1559_v10  ;;  %v1684_v51 = vadd.s32 %v1542_v2, %v483_v47  ;;  %v1707_v59 = vadd.s32 %v1542_v2, %v468_v55 }
  0x43   : > { %vm2249_vm9 = vcmp.lt.s32.totalorder %v1658_v42, %v1559_v10  ;;  %v661_v48 = vsel %vm2250_vm8, %v1665_v44, 0.0  ;;  %vm2252_vm10 = vcmp.lt.s32.totalorder %v1681_v50, %v1559_v10  ;;  %v1710_v60 = vadd.s32 %v1542_v2, %v484_v56 }
  0x44   : > { %v677_v49 = vsel %vm2249_vm9, %v1668_v45, 0.0  ;;  %vm2251_vm11 = vcmp.lt.s32.totalorder %v1684_v51, %v1559_v10  ;;  %v662_v57 = vsel %vm2252_vm10, %v1691_v53, 0.0  ;;  %vm2254_vm12 = vcmp.lt.s32.totalorder %v1707_v59, %v1559_v10 }
  0x45   : > { %v1278_v52 = vpack.i.bf16 %v677_v49, %v661_v48  ;;  %v678_v58 = vsel %vm2251_vm11, %v1694_v54, 0.0  ;;  %vm2253_vm13 = vcmp.lt.s32.totalorder %v1710_v60, %v1559_v10  ;;  %v469_v0 = vadd.s32 56, %v1544_v3  ;;  %v1795_v48 = vld [vmem:[%s1538_s14 + $0x48] sm:$0xff] }
  0x46   : > { %v1280_v61 = vpack.i.bf16 %v678_v58, %v662_v57  ;;  %v485_v1 = vadd.s32 184, %v1544_v3  ;;  %v663_v4 = vsel %vm2254_vm12, %v1717_v62, 0.0  ;;  %v679_v6 = vsel %vm2253_vm13, %v1720_v63, 0.0  ;;  %v1798_v49 = vld [vmem:[%s1538_s14 + $0xc8] sm:$0xff] }
  0x47   : > { %1273 = vxpose.xlu0.b32.cont [2/16] %v1272_v25, 128  ;;  %v1733_v7 = vadd.s32 %v1542_v2, %v469_v0  ;;  %v1282_v15 = vpack.i.bf16 %v679_v6, %v663_v4  ;;  %v470_v20 = vadd.s32 64, %v1544_v3  ;;  %v486_v21 = vadd.s32 192, %v1544_v3  ;;  %v1823_v6 = vld [vmem:[%s1538_s14 + $0x50] sm:$0xff] }
  0x48   : > { %v1736_v14 = vadd.s32 %v1542_v2, %v485_v1  ;;  %v471_v37 = vadd.s32 72, %v1544_v3  ;;  %v487_v38 = vadd.s32 200, %v1544_v3  ;;  %v488_v55 = vadd.s32 208, %v1544_v3 }
  0x49   : > { %vm536_vm14 = vcmp.lt.s32.totalorder %v1733_v7, %v1559_v10  ;;  %v1759_v28 = vadd.s32 %v1542_v2, %v470_v20  ;;  %v1762_v29 = vadd.s32 %v1542_v2, %v486_v21  ;;  %v473_v1 = vadd.s32 88, %v1544_v3  ;;  %v2316_v7 = vld [vmem:[#allocation15_spill] sm:$0xff] }
  0x4a   : > { %vm2256_vm15 = vcmp.lt.s32.totalorder %v1736_v14, %v1559_v10  ;;  %v664_v22 = vsel %vm536_vm14, %v1743_v16, 0.0  ;;  %v1788_v46 = vadd.s32 %v1542_v2, %v487_v38  ;;  %v489_v4 = vadd.s32 216, %v1544_v3  ;;  %v1850_v38 = vld [vmem:[%s1538_s14 + $0xd8] sm:$0xff] }
  0x4b   : > { %v680_v25 = vsel %vm2256_vm15, %v1746_v17, 0.0  ;;  %vm537_vm1 = vcmp.lt.s32.totalorder %v1759_v28, %v1559_v10  ;;  %vm553_vm0 = vcmp.lt.s32.totalorder %v1762_v29, %v1559_v10  ;;  %v1829_v20 = vadd.s32 %v1542_v2, %v473_v1 }
  0x4c   : > { %v1284_v30 = vpack.i.bf16 %v680_v25, %v664_v22  ;;  %v665_v39 = vsel %vm537_vm1, %v1769_v31, 0.0  ;;  %vm554_vm2 = vcmp.lt.s32.totalorder %v1788_v46, %v1559_v10  ;;  %v1832_v21 = vadd.s32 %v1542_v2, %v489_v4 }
  0x4d   : > { %v682_v57 = vsel %vm554_vm2, %v1798_v49, 0.0  ;;  %vm540_vm7 = vcmp.lt.s32.totalorder %v1829_v20, %v1559_v10  ;;  %v477_v1 = vadd.s32 120, %v1544_v3  ;;  %v493_v4 = vadd.s32 248, %v1544_v3 }
  0x4e   : > { %vm556_vm6 = vcmp.lt.s32.totalorder %v1832_v21, %v1559_v10  ;;  %v451_v18 = vmul.f32 %v429_v13, %v429_v13 }
  0x4f   : > { %1275 = vxpose.xlu0.b32.cont [3/16] %v1274_v34, 128  ;;  %v1772_v34 = vld [vmem:[%s1538_s14 + $0xc0] sm:$0xff]  ;;  %v1877_v11 = vadd.s32 %v1542_v2, %v477_v1  ;;  %v1880_v5 = vadd.s32 %v1542_v2, %v493_v4  ;;  %v590_v1 = vld [vmem:[%s1538_s14 + $0xe8] sm:$0xff] }
  0x50   : > { %v681_v40 = vsel %vm553_vm0, %v1772_v34, 0.0  ;;  %v428_v4 = vld [vmem:[%s1511_s17] sm:$0xff] }
  0x51   : > { %v1286_v47 = vpack.i.bf16 %v681_v40, %v665_v39  ;;  %v474_v39 = vadd.s32 96, %v1544_v3  ;;  %v490_v40 = vadd.s32 224, %v1544_v3  ;;  %2284 = vst [vmem:[#allocation19_spill] sm:$0xff] %v1877_v11  ;;  %vm2255_vm9 = vcmp.lt.s32.totalorder %v1877_v11, %v1559_v10 }
  0x52   : > { %2285 = vst [vmem:[#allocation20_spill] sm:$0xff] %v1880_v5  ;;  %vm560_vm8 = vcmp.lt.s32.totalorder %v1880_v5, %v1559_v10  ;;  %v431_v12 = vmul.f32 %v429_v13, %v428_v4  ;;  %v452_v11 = vrot.slane %v451_v18, 4 }
  0x54   : > { %v432_v5 = vrot.slane %v431_v12, 4  ;;  %v453_v24 = vadd.f32 %v452_v11, %v451_v18 }
  0x57   : > { %1277 = vxpose.xlu0.b32.cont [4/16] %v1276_v43, 128  ;;  %v1785_v43 = vadd.s32 %v1542_v2, %v471_v37  ;;  %v1847_v37 = vld [vmem:[%s1538_s14 + $0x58] sm:$0xff] }
  0x59   : > { %vm538_vm3 = vcmp.lt.s32.totalorder %v1785_v43, %v1559_v10 }
  0x5a   : > { %v666_v56 = vsel %vm538_vm3, %v1795_v48, 0.0 }
  0x5b   : > { %v1288_v0 = vpack.i.bf16 %v682_v57, %v666_v56  ;;  %v684_v56 = vsel %vm556_vm6, %v1850_v38, 0.0  ;;  %v475_v57 = vadd.s32 104, %v1544_v3 }
  0x5f   : > { %1279 = vxpose.xlu0.b32.cont [5/16] %v1278_v52, 128  ;;  %v472_v52 = vadd.s32 80, %v1544_v3 }
  0x61   : > { %v1811_v58 = vadd.s32 %v1542_v2, %v472_v52  ;;  %v492_v52 = vadd.s32 240, %v1544_v3 }
  0x63   : > { %vm539_vm5 = vcmp.lt.s32.totalorder %v1811_v58, %v1559_v10 }
  0x64   : > { %v667_v22 = vsel %vm539_vm5, %v1823_v6, 0.0 }
  0x67   : > { %1281 = vxpose.xlu0.b32.cont [6/16] %v1280_v61, 128  ;;  %v1814_v61 = vadd.s32 %v1542_v2, %v488_v55  ;;  %v668_v55 = vsel %vm540_vm7, %v1847_v37, 0.0 }
  0x68   : > { %v1292_v8 = vpack.i.bf16 %v684_v56, %v668_v55  ;;  %v1911_v55 = vld [vmem:[%s1538_s14 + $0x70] sm:$0xff] }
  0x69   : > { %vm555_vm4 = vcmp.lt.s32.totalorder %v1814_v61, %v1559_v10  ;;  %v1914_v56 = vld [vmem:[%s1538_s14 + $0xf0] sm:$0xff] }
  0x6f   : > { %1283 = vxpose.xlu0.b32.cont [7/16] %v1282_v15, 128  ;;  %v1826_v15 = vld [vmem:[%s1538_s14 + $0xd0] sm:$0xff] }
  0x70   : > { %v683_v25 = vsel %vm555_vm4, %v1826_v15, 0.0 }
  0x77   : > { %1285 = vxpose.xlu0.b32.cont [8/16] %v1284_v30, 128  ;;  %v1290_v30 = vpack.i.bf16 %v683_v25, %v667_v22  ;;  %v507_v22 = vadd.s32 %v1542_v2, %v474_v39  ;;  %v523_v25 = vadd.s32 %v1542_v2, %v490_v40  ;;  %v1889_v40 = vld [vmem:[%s1538_s14 + $0x78] sm:$0xff] }
  0x78   : > { %2286 = vst [vmem:[#allocation21_spill] sm:$0xff] %v1889_v40  ;;  %1161 = vmatpush.msk.msra.mxu0 %vm2255_vm9, %v1889_v40  ;;  %1197 = vmatpush.msk.msra.mxu2 %vm2255_vm9, %v1889_v40 }
  0x79   : > { %vm541_vm11 = vcmp.lt.s32.totalorder %v507_v22, %v1559_v10  ;;  %vm557_vm10 = vcmp.lt.s32.totalorder %v523_v25, %v1559_v10  ;;  %v440_v25 = vld [vmem:[#allocation4] sm:$0x1] }
  0x7f   : > { %1287 = vxpose.xlu0.b32.cont [9/16] %v1286_v47, 128  ;;  %v476_v47 = vadd.s32 112, %v1544_v3 }
  0x81   : > { %v1871_v9 = vadd.s32 %v1542_v2, %v476_v47  ;;  %v1892_v47 = vld [vmem:[%s1538_s14 + $0xf8] sm:$0xff] }
  0x82   : > { %2287 = vst [vmem:[#allocation22_spill] sm:$0xff] %v1892_v47  ;;  %1177 = vmatpush.msk.msra.mxu1 %vm560_vm8, %v1892_v47  ;;  %1213 = vmatpush.msk.msra.mxu3 %vm560_vm8, %v1892_v47 }
  0x83   : > { %vm543_vm13 = vcmp.lt.s32.totalorder %v1871_v9, %v1559_v10 }
  0x84   : > { %1162 = vmatpush.msk.msra.mxu0 %vm543_vm13, %v1911_v55  ;;  %1198 = vmatpush.msk.msra.mxu2 %vm543_vm13, %v1911_v55  ;;  %v671_v28 = vsel %vm543_vm13, %v1911_v55, 0.0  ;;  %vm2300_vm13 = vcmp.lt.s32.totalorder %v1632_v33, %v1559_v10 }
  0x87   : > { %1289 = vxpose.xlu0.b32.cont [10/16] %v1288_v0, 128  ;;  %v491_v0 = vadd.s32 232, %v1544_v3  ;;  %v508_v3 = vadd.s32 %v1542_v2, %v475_v57  ;;  %v574_v57 = vld [vmem:[%s1538_s14 + $0x68] sm:$0xff] }
  0x89   : > { %v524_v39 = vadd.s32 %v1542_v2, %v491_v0  ;;  %vm542_vm9 = vcmp.lt.s32.totalorder %v508_v3, %v1559_v10  ;;  %v450_v3 = vld [vmem:[#allocation5] sm:$0x1] }
  0x8a   : > { %1163 = vmatpush.msk.msra.mxu0 %vm542_vm9, %v574_v57  ;;  %1199 = vmatpush.msk.msra.mxu2 %vm542_vm9, %v574_v57  ;;  %v670_v18 = vsel %vm542_vm9, %v574_v57, 0.0  ;;  %vm2296_vm9 = vcmp.lt.s32.totalorder %v1658_v42, %v1559_v10  ;;  %v2320_v42 = vld [vmem:[#allocation11_spill] sm:$0xff] }
  0x8b   : > { %vm558_vm15 = vcmp.lt.s32.totalorder %v524_v39, %v1559_v10 }
  0x8f   : > { %1291 = vxpose.xlu0.b32.cont [11/16] %v1290_v30, 128  ;;  %v1874_v30 = vadd.s32 %v1542_v2, %v492_v52  ;;  %v573_v52 = vld [vmem:[%s1538_s14 + $0x60] sm:$0xff] }
  0x90   : > { %v589_v2 = vld [vmem:[%s1538_s14 + $0xe0] sm:$0xff]  ;;  %v669_v0 = vsel %vm541_vm11, %v573_v52, 0.0  ;;  %1164 = vmatpush.msk.msra.mxu0 %vm541_vm11, %v573_v52  ;;  %1200 = vmatpush.msk.msra.mxu2 %vm541_vm11, %v573_v52 }
  0x91   : > { %vm559_vm12 = vcmp.lt.s32.totalorder %v1874_v30, %v1559_v10  ;;  %v685_v19 = vsel %vm557_vm10, %v589_v2, 0.0 }
  0x92   : > { %1178 = vmatpush.msk.msra.mxu1 %vm559_vm12, %v1914_v56  ;;  %1214 = vmatpush.msk.msra.mxu3 %vm559_vm12, %v1914_v56  ;;  %v1294_v13 = vpack.i.bf16 %v685_v19, %v669_v0  ;;  %v686_v19 = vsel %vm558_vm15, %v590_v1, 0.0  ;;  %v687_v29 = vsel %vm559_vm12, %v1914_v56, 0.0  ;;  %vm2299_vm12 = vcmp.lt.s32.totalorder %v1629_v32, %v1559_v10 }
  0x93   : > { %1165 = vmatpush.msk.msra.mxu0 %vm540_vm7, %v1847_v37  ;;  %1201 = vmatpush.msk.msra.mxu2 %vm540_vm7, %v1847_v37  ;;  %v1296_v58 = vpack.i.bf16 %v686_v19, %v670_v18  ;;  %vm2295_vm7 = vcmp.lt.s32.totalorder %v1655_v41, %v1559_v10  ;;  %v1298_v9 = vpack.i.bf16 %v687_v29, %v671_v28 }
  0x94   : > { %1179 = vmatpush.msk.msra.mxu1 %vm558_vm15, %v590_v1  ;;  %1215 = vmatpush.msk.msra.mxu3 %vm558_vm15, %v590_v1  ;;  %vm2302_vm15 = vmmov %vm2295_vm7 }
  0x95   : > { %1166 = vmatpush.msk.msra.mxu0 %vm539_vm5, %v1823_v6  ;;  %1202 = vmatpush.msk.msra.mxu2 %vm539_vm5, %v1823_v6  ;;  %v430_v6 = vld [vmem:[#allocation3] sm:$0x1] }
  0x96   : > { %1180 = vmatpush.msk.msra.mxu1 %vm557_vm10, %v589_v2  ;;  %1216 = vmatpush.msk.msra.mxu3 %vm557_vm10, %v589_v2 }
  0x97   : > { %1293 = vxpose.xlu0.b32.cont [12/16] %v1292_v8, 128  ;;  %v441_v8 = vmul.f32 %v428_v4, %v428_v4  ;;  %v433_v4 = vadd.f32 %v432_v5, %v431_v12  ;;  %v454_v12 = vrot.slane %v453_v24, 2  ;;  %1167 = vmatpush.msk.msra.mxu0 %vm538_vm3, %v1795_v48 }
  0x98   : > { %1181 = vmatpush.msk.msra.mxu1 %vm556_vm6, %v1850_v38  ;;  %1217 = vmatpush.msk.msra.mxu3 %vm556_vm6, %v1850_v38 }
  0x99   : > { %v442_v47 = vrot.slane %v441_v8, 4  ;;  %v434_v5 = vrot.slane %v433_v4, 2  ;;  %v455_v22 = vadd.f32 %v454_v12, %v453_v24  ;;  %1168 = vmatpush.msk.msra.mxu0 %vm537_vm1, %v1769_v31  ;;  %1203 = vmatpush.msk.msra.mxu2 %vm538_vm3, %v1795_v48  ;;  %vm2290_vm3 = vcmp.lt.s32.totalorder %v1710_v60, %v1559_v10  ;;  %v2312_v60 = vld [vmem:[#allocation16_spill] sm:$0xff] }
  0x9a   : > { %1182 = vmatpush.msk.msra.mxu1 %vm555_vm4, %v1826_v15  ;;  %1218 = vmatpush.msk.msra.mxu3 %vm555_vm4, %v1826_v15  ;;  %vm2288_vm4 = vcmp.lt.s32.totalorder %v1736_v14, %v1559_v10  ;;  %vm2297_vm10 = vmmov %vm2290_vm3  ;;  %v2323_v14 = vld [vmem:[#allocation13_spill] sm:$0xff] }
  0x9b   : > { %v443_v40 = vadd.f32 %v442_v47, %v441_v8  ;;  %v435_v20 = vadd.f32 %v434_v5, %v433_v4  ;;  %v456_v38 = vrot.slane %v455_v22, 1  ;;  %1169 = vmatpush.msk.msra.mxu0 %vm536_vm14, %v1743_v16  ;;  %1204 = vmatpush.msk.msra.mxu2 %vm537_vm1, %v1769_v31  ;;  %vm2292_vm1 = vcmp.lt.s32.totalorder %v1684_v51, %v1559_v10  ;;  %vm2293_vm5 = vmmov %vm2288_vm4  ;;  %v2307_v51 = vld [vmem:[#allocation21_spill] sm:$0xff] }
  0x9c   : > { %1183 = vmatpush.msk.msra.mxu1 %vm554_vm2, %v1798_v49  ;;  %1219 = vmatpush.msk.msra.mxu3 %vm554_vm2, %v1798_v49  ;;  %vm2289_vm2 = vcmp.lt.s32.totalorder %v1707_v59, %v1559_v10 }
  0x9d   : > { %v444_v11 = vrot.slane %v443_v40, 2  ;;  %v436_v24 = vrot.slane %v435_v20, 1  ;;  %v457_v39 = vadd.f32 %v456_v38, %v455_v22  ;;  %1170 = vmatpush.msk.msra.mxu0 %vm2289_vm2, %v1717_v62  ;;  %1205 = vmatpush.msk.msra.mxu2 %vm536_vm14, %v1743_v16  ;;  %vm2294_vm6 = vmmov %vm2289_vm2  ;;  %v2324_v16 = vld [vmem:[#allocation12_spill] sm:$0xff] }
  0x9e   : > { %1184 = vmatpush.msk.msra.mxu1 %vm553_vm0, %v1772_v34  ;;  %1220 = vmatpush.msk.msra.mxu3 %vm553_vm0, %v1772_v34  ;;  %vm2291_vm0 = vcmp.lt.s32.totalorder %v1681_v50, %v1559_v10  ;;  %vm2301_vm14 = vmmov %vm2292_vm1  ;;  %v2304_v50 = vld [vmem:[#allocation18_spill] sm:$0xff] }
  0x9f   : > { %1295 = vxpose.xlu0.b32.cont [13/16] %v1294_v13, 128  ;;  %v445_v37 = vadd.f32 %v444_v11, %v443_v40  ;;  %v437_v61 = vadd.f32 %v436_v24, %v435_v20  ;;  %v458_v48 = vadd.f32 %v457_v39, %v450_v3  ;;  %1171 = vmatpush.msk.msra.mxu0 %vm2291_vm0, %v1691_v53  ;;  %vm2298_vm11 = vmmov %vm2291_vm0 }
  0xa0   : > { %1185 = vmatpush.msk.msra.mxu1 %vm2288_vm4, %v1746_v17  ;;  %1221 = vmatpush.msk.msra.mxu3 %vm2293_vm5, %v1746_v17  ;;  %vm2303_vm4 = vcmp.lt.s32.totalorder %v1603_v23, %v1559_v10  ;;  %vm2305_vm2 = vcmp.lt.s32.totalorder %v2304_v50, %v1559_v10  ;;  %vm2317_vm5 = vcmp.lt.s32.totalorder %v2316_v7, %v1559_v10 }
  0xa1   : > { %v446_v21 = vrot.slane %v445_v37, 1  ;;  %v438_v43 = vadd.f32 %v437_v61, %v430_v6  ;;  %1206 = vmatpush.msk.msra.mxu2 %vm2294_vm6, %v1717_v62  ;;  %459 = vst [vmem:[#allocation5] sm:$0x1] %v458_v48  ;;  %1172 = vmatpush.msk.msra.mxu0 %vm2295_vm7, %v1665_v44  ;;  %v2313_v62 = vld [vmem:[#allocation14_spill] sm:$0xff]  ;;  %vm2318_vm6 = vmmov %vm2299_vm12 }
  0xa2   : > { %1186 = vmatpush.msk.msra.mxu1 %vm2290_vm3, %v1720_v63  ;;  %1222 = vmatpush.msk.msra.mxu3 %vm2297_vm10, %v1720_v63  ;;  %vm2306_vm3 = vmmov %vm2296_vm9  ;;  %v2315_v63 = vld [vmem:[#allocation17_spill] sm:$0xff] }
  0xa3   : > { %v447_v15 = vadd.f32 %v446_v21, %v445_v37  ;;  %439 = vst [vmem:[#allocation3] sm:$0x1] %v438_v43  ;;  %1207 = vmatpush.msk.msra.mxu2 %vm2298_vm11, %v1691_v53  ;;  %1173 = vmatpush.msk.msra.mxu0 %vm2299_vm12, %v1639_v35  ;;  %v2308_v53 = vld [vmem:[#allocation19_spill] sm:$0xff]  ;;  %vm2319_vm7 = vmmov %vm2300_vm13 }
  0xa4   : > { %1187 = vmatpush.msk.msra.mxu1 %vm2292_vm1, %v1694_v54  ;;  %1223 = vmatpush.msk.msra.mxu3 %vm2301_vm14, %v1694_v54  ;;  %vm2309_vm0 = vcmp.lt.s32.totalorder %v2308_v53, %v1559_v10  ;;  %vm2314_vm1 = vcmp.lt.s32.totalorder %v2313_v62, %v1559_v10  ;;  %vm2326_vm10 = vmmov %vm2303_vm4 }
  0xa5   : > { %v448_v46 = vadd.f32 %v447_v15, %v440_v25  ;;  %1208 = vmatpush.msk.msra.mxu2 %vm2302_vm15, %v1665_v44  ;;  %1174 = vmatpush.msk.msra.mxu0 %vm2303_vm4, %v1613_v26  ;;  %v672_v41 = vsel %vm2309_vm0, %v2307_v51, 0.0  ;;  %v2310_v44 = vld [vmem:[#allocation22_spill] sm:$0xff]  ;;  %vm2327_vm11 = vmmov %vm2305_vm2  ;;  %v689_v51 = vld [vmem:[#allocation2 + $0x30] sm:$0xff] }
  0xa6   : > { %1188 = vmatpush.msk.msra.mxu1 %vm2296_vm9, %v1668_v45  ;;  %1224 = vmatpush.msk.msra.mxu3 %vm2306_vm3, %v1668_v45  ;;  %v688_v59 = vsel %vm560_vm8, %v2310_v44, 0.0  ;;  %v2321_v45 = vld [vmem:[#allocation10_spill] sm:$0xff]  ;;  %vm2325_vm9 = vcmp.lt.s32.totalorder %v2324_v16, %v1559_v10  ;;  %vm2328_vm12 = vmmov %vm2314_vm1 }
  0xa7   : > { %1297 = vxpose.xlu0.b32.cont [14/16] %v1296_v58, 128  ;;  %449 = vst [vmem:[#allocation4] sm:$0x1] %v448_v46  ;;  %1175 = vmatpush.msk.msra.mxu0 %vm2314_vm1, %v2312_v60  ;;  %vm2322_vm8 = vcmp.lt.s32.totalorder %v2321_v45, %v1559_v10  ;;  %v1300_v17 = vpack.i.bf16 %v688_v59, %v672_v41  ;;  %vm2331_vm15 = vmmov %vm2325_vm9  ;;  %v690_v59 = vld [vmem:[#allocation2] sm:$0xff] }
  0xa8   : > { %1189 = vmatpush.msk.msra.mxu1 %vm2300_vm13, %v1642_v36  ;;  %1209 = vmatpush.msk.msra.mxu2 %vm2318_vm6, %v1639_v35  ;;  %vm2329_vm13 = vmmov %vm2317_vm5 }
  0xa9   : > { %1225 = vmatpush.msk.msra.mxu3 %vm2319_vm7, %v1642_v36  ;;  %1176 = vmatpush.msk.msra.mxu0 %vm2322_vm8, %v2320_v42  ;;  %vm2330_vm14 = vmmov %vm2322_vm8 }
  0xaa   : > { %1190 = vmatpush.msk.msra.mxu1 %vm2305_vm2, %v1616_v27  ;;  %1210 = vmatpush.msk.msra.mxu2 %vm2326_vm10, %v1613_v26 }
  0xab   : > { %1226 = vmatpush.msk.msra.mxu3 %vm2327_vm11, %v1616_v27 }
  0xac   : > { %1191 = vmatpush.msk.msra.mxu1 %vm2317_vm5, %v2315_v63  ;;  %1211 = vmatpush.msk.msra.mxu2 %vm2328_vm12, %v2312_v60 }
  0xad   : > { %1227 = vmatpush.msk.msra.mxu3 %vm2329_vm13, %v2315_v63 }
  0xae   : > { %1192 = vmatpush.msk.msra.mxu1 %vm2325_vm9, %v2323_v14  ;;  %1212 = vmatpush.msk.msra.mxu2 %vm2330_vm14, %v2320_v42  ;;  %v691_v42 = vld [vmem:[#allocation2 + $0x58] sm:$0xff] }
  0xaf   : > { %1299 = vxpose.xlu0.b32.cont [15/16] %v1298_v9, 128  ;;  %1228 = vmatpush.msk.msra.mxu3 %vm2331_vm15, %v2323_v14 }
  0xb7   : > { %1301 = vxpose.xlu0.b32.end [16/16] %v1300_v17, 128 }
  0xe3   : > { %v1302_v23 = vpop.trf.xlu0 }
  0xe4   : > { %v1303_v26 = vunpack.i.l.bf16 %v1302_v23  ;;  %v1306_v27 = vunpack.i.h.bf16 %v1302_v23  ;;  %v692_v23 = vld [vmem:[#allocation2 + $0x18] sm:$0xff] }
  0xe6   : > { %785 = vmatmul.f32.vlgmr.msra.gmra.mxu0 %v1303_v26  ;;  %850 = vmatmul.f32.vlgmr.msra.gmra.mxu1 %v1306_v27 }
  0xeb   : > { %v1307_v32 = vpop.trf.xlu0 }
  0xec   : > { %v1308_v33 = vunpack.i.l.bf16 %v1307_v32  ;;  %v1311_v35 = vunpack.i.h.bf16 %v1307_v32 }
  0xee   : > { %788 = vmatmul.f32.gmra.mxu0 %v1308_v33  ;;  %853 = vmatmul.f32.gmra.mxu1 %v1311_v35  ;;  %v693_v35 = vld [vmem:[#allocation2 + $0x50] sm:$0xff] }
  0xf3   : > { %v1312_v36 = vpop.trf.xlu0 }
  0xf4   : > { %v1313_v31 = vunpack.i.l.bf16 %v1312_v36  ;;  %v1316_v34 = vunpack.i.h.bf16 %v1312_v36 }
  0xf6   : > { %791 = vmatmul.f32.gmra.mxu0 %v1313_v31  ;;  %856 = vmatmul.f32.gmra.mxu1 %v1316_v34 }
  0xfb   : > { %v1317_v49 = vpop.trf.xlu0 }
  0xfc   : > { %v1318_v30 = vunpack.i.l.bf16 %v1317_v49  ;;  %v1321_v40 = vunpack.i.h.bf16 %v1317_v49 }
  0xfe   : > { %794 = vmatmul.f32.gmra.mxu0 %v1318_v30  ;;  %859 = vmatmul.f32.gmra.mxu1 %v1321_v40  ;;  %v694_v30 = vld [vmem:[#allocation2 + $0x68] sm:$0xff] }
 0x103   : > { %v1322_v10 = vpop.trf.xlu0 }
 0x104   : > { %v1323_v47 = vunpack.i.l.bf16 %v1322_v10  ;;  %v1326_v52 = vunpack.i.h.bf16 %v1322_v10 }
 0x106   : > { %797 = vmatmul.f32.gmra.mxu0 %v1323_v47  ;;  %862 = vmatmul.f32.gmra.mxu1 %v1326_v52 }
 0x10b   : > { %v1327_v2 = vpop.trf.xlu0 }
 0x10c   : > { %v1328_v55 = vunpack.i.l.bf16 %v1327_v2  ;;  %v1331_v56 = vunpack.i.h.bf16 %v1327_v2  ;;  %v695_v2 = vld [vmem:[#allocation2 + $0x8] sm:$0xff] }
 0x10e   : > { %800 = vmatmul.f32.gmra.mxu0 %v1328_v55  ;;  %865 = vmatmul.f32.gmra.mxu1 %v1331_v56 }
 0x113   : > { %v1332_v57 = vpop.trf.xlu0 }
 0x114   : > { %v1333_v0 = vunpack.i.l.bf16 %v1332_v57  ;;  %v1336_v1 = vunpack.i.h.bf16 %v1332_v57 }
 0x116   : > { %803 = vmatmul.f32.gmra.mxu0 %v1333_v0  ;;  %868 = vmatmul.f32.gmra.mxu1 %v1336_v1  ;;  %v696_v1 = vld [vmem:[#allocation2 + $0x48] sm:$0xff] }
 0x11b   : > { %v1337_v8 = vpop.trf.xlu0 }
 0x11c   : > { %v1338_v13 = vunpack.i.l.bf16 %v1337_v8  ;;  %v1341_v4 = vunpack.i.h.bf16 %v1337_v8 }
 0x11e   : > { %806 = vmatmul.f32.gmra.mxu0 %v1338_v13  ;;  %871 = vmatmul.f32.gmra.mxu1 %v1341_v4 }
 0x123   : > { %v1342_v5 = vpop.trf.xlu0 }
 0x124   : > { %v1343_v11 = vunpack.i.l.bf16 %v1342_v5  ;;  %v1346_v12 = vunpack.i.h.bf16 %v1342_v5 }
 0x126   : > { %809 = vmatmul.f32.vlgmr.msra.gmra.mxu2 %v1343_v11  ;;  %874 = vmatmul.f32.vlgmr.msra.gmra.mxu3 %v1346_v12  ;;  %v697_v11 = vld [vmem:[#allocation2 + $0x40] sm:$0xff] }
 0x12b   : > { %v1347_v18 = vpop.trf.xlu0 }
 0x12c   : > { %v1348_v19 = vunpack.i.l.bf16 %v1347_v18  ;;  %v1351_v20 = vunpack.i.h.bf16 %v1347_v18 }
 0x12e   : > { %812 = vmatmul.f32.gmra.mxu2 %v1348_v19  ;;  %877 = vmatmul.f32.gmra.mxu3 %v1351_v20 }
 0x133   : > { %v1352_v37 = vpop.trf.xlu0 }
 0x134   : > { %v1353_v22 = vunpack.i.l.bf16 %v1352_v37  ;;  %v1356_v24 = vunpack.i.h.bf16 %v1352_v37  ;;  %v698_v37 = vld [vmem:[#allocation2 + $0x20] sm:$0xff] }
 0x136   : > { %815 = vmatmul.f32.gmra.mxu2 %v1353_v22  ;;  %880 = vmatmul.f32.gmra.mxu3 %v1356_v24 }
 0x13b   : > { %v1357_v21 = vpop.trf.xlu0 }
 0x13c   : > { %v1358_v38 = vunpack.i.l.bf16 %v1357_v21  ;;  %v1361_v58 = vunpack.i.h.bf16 %v1357_v21 }
 0x13e   : > { %818 = vmatmul.f32.gmra.mxu2 %v1358_v38  ;;  %883 = vmatmul.f32.gmra.mxu3 %v1361_v58  ;;  %v699_v58 = vld [vmem:[#allocation2 + $0x10] sm:$0xff] }
 0x143   : > { %v1362_v6 = vpop.trf.xlu0 }
 0x144   : > { %v1363_v25 = vunpack.i.l.bf16 %v1362_v6  ;;  %v1366_v3 = vunpack.i.h.bf16 %v1362_v6 }
 0x146   : > { %821 = vmatmul.f32.gmra.mxu2 %v1363_v25  ;;  %886 = vmatmul.f32.gmra.mxu3 %v1366_v3 }
 0x14b   : > { %v1367_v61 = vpop.trf.xlu0 }
 0x14c   : > { %v1368_v15 = vunpack.i.l.bf16 %v1367_v61  ;;  %v1371_v39 = vunpack.i.h.bf16 %v1367_v61 }
 0x14e   : > { %824 = vmatmul.f32.gmra.mxu2 %v1368_v15  ;;  %889 = vmatmul.f32.gmra.mxu3 %v1371_v39  ;;  %v700_v15 = vld [vmem:[#allocation2 + $0x38] sm:$0xff] }
 0x153   : > { %v1372_v43 = vpop.trf.xlu0 }
 0x154   : > { %v1373_v46 = vunpack.i.l.bf16 %v1372_v43  ;;  %v1376_v48 = vunpack.i.h.bf16 %v1372_v43 }
 0x156   : > { %827 = vmatmul.f32.gmra.mxu2 %v1373_v46  ;;  %892 = vmatmul.f32.gmra.mxu3 %v1376_v48 }
 0x15b   : > { %v1377_v28 = vpop.trf.xlu0 }
 0x15c   : > { %v1378_v29 = vunpack.i.l.bf16 %v1377_v28  ;;  %v1381_v9 = vunpack.i.h.bf16 %v1377_v28  ;;  %v701_v28 = vld [vmem:[#allocation2 + $0x60] sm:$0xff] }
 0x15e   : > { %830 = vmatmul.f32.gmra.mxu2 %v1378_v29  ;;  %895 = vmatmul.f32.gmra.mxu3 %v1381_v9 }
 0x163   : > { %v786_v50 = vpop.f32.mrf.mxu0  ;;  %v851_v53 = vpop.f32.mrf.mxu1 }
 0x164   : > { %v852_v41 = vadd.f32 %v851_v53, %v786_v50  ;;  %v702_v53 = vld [vmem:[#allocation2 + $0x70] sm:$0xff] }
 0x166   : > { %v899_v44 = vadd.f32 %v852_v41, %v689_v51 }
 0x168   : > { %915 = vst [vmem:[#allocation2 + $0x30] sm:$0xff] %v899_v44 }
 0x16b   : > { %v789_v54 = vpop.f32.mrf.mxu0  ;;  %v854_v60 = vpop.f32.mrf.mxu1 }
 0x16c   : > { %v855_v62 = vadd.f32 %v854_v60, %v789_v54  ;;  %v703_v60 = vld [vmem:[#allocation2 + $0x78] sm:$0xff] }
 0x16e   : > { %v900_v63 = vadd.f32 %v855_v62, %v690_v59 }
 0x170   : > { %916 = vst [vmem:[#allocation2] sm:$0xff] %v900_v63 }
 0x173   : > { %v792_v7 = vpop.f32.mrf.mxu0  ;;  %v857_v45 = vpop.f32.mrf.mxu1 }
 0x174   : > { %v858_v14 = vadd.f32 %v857_v45, %v792_v7  ;;  %v704_v45 = vld [vmem:[#allocation2 + $0x28] sm:$0xff] }
 0x176   : > { %v901_v16 = vadd.f32 %v858_v14, %v691_v42 }
 0x178   : > { %917 = vst [vmem:[#allocation2 + $0x58] sm:$0xff] %v901_v16 }
 0x17b   : > { %v795_v17 = vpop.f32.mrf.mxu0  ;;  %v860_v26 = vpop.f32.mrf.mxu1 }
 0x17c   : > { %v861_v27 = vadd.f32 %v860_v26, %v795_v17 }
 0x17e   : > { %v902_v32 = vadd.f32 %v861_v27, %v692_v23 }
 0x180   : > { %918 = vst [vmem:[#allocation2 + $0x18] sm:$0xff] %v902_v32 }
 0x183   : > { %v798_v33 = vpop.f32.mrf.mxu0  ;;  %v863_v36 = vpop.f32.mrf.mxu1 }
 0x184   : > { %v864_v31 = vadd.f32 %v863_v36, %v798_v33 }
 0x186   : > { %v903_v34 = vadd.f32 %v864_v31, %v693_v35 }
 0x188   : > { %919 = vst [vmem:[#allocation2 + $0x50] sm:$0xff] %v903_v34 }
 0x18b   : > { %v801_v49 = vpop.f32.mrf.mxu0  ;;  %v866_v40 = vpop.f32.mrf.mxu1 }
 0x18c   : > { %v867_v10 = vadd.f32 %v866_v40, %v801_v49 }
 0x18e   : > { %v904_v47 = vadd.f32 %v867_v10, %v694_v30 }
 0x190   : > { %920 = vst [vmem:[#allocation2 + $0x68] sm:$0xff] %v904_v47 }
 0x193   : > { %v804_v52 = vpop.f32.mrf.mxu0  ;;  %v869_v55 = vpop.f32.mrf.mxu1 }
 0x194   : > { %v870_v56 = vadd.f32 %v869_v55, %v804_v52 }
 0x196   : > { %v905_v57 = vadd.f32 %v870_v56, %v695_v2 }
 0x198   : > { %921 = vst [vmem:[#allocation2 + $0x8] sm:$0xff] %v905_v57 }
 0x19b   : > { %v807_v0 = vpop.f32.mrf.mxu0  ;;  %v872_v8 = vpop.f32.mrf.mxu1 }
 0x19c   : > { %v873_v13 = vadd.f32 %v872_v8, %v807_v0 }
 0x19e   : > { %v906_v4 = vadd.f32 %v873_v13, %v696_v1 }
 0x1a0   : > { %922 = vst [vmem:[#allocation2 + $0x48] sm:$0xff] %v906_v4 }
 0x1a9   : > { %v810_v5 = vpop.f32.mrf.mxu2  ;;  %v875_v12 = vpop.f32.mrf.mxu3 }
 0x1aa   : > { %v876_v18 = vadd.f32 %v875_v12, %v810_v5 }
 0x1ac   : > { %v907_v19 = vadd.f32 %v876_v18, %v697_v11 }
 0x1ae   : > { %923 = vst [vmem:[#allocation2 + $0x40] sm:$0xff] %v907_v19 }
 0x1b1   : > { %v813_v20 = vpop.f32.mrf.mxu2  ;;  %v878_v22 = vpop.f32.mrf.mxu3 }
 0x1b2   : > { %v879_v24 = vadd.f32 %v878_v22, %v813_v20 }
 0x1b4   : > { %v908_v21 = vadd.f32 %v879_v24, %v698_v37 }
 0x1b6   : > { %924 = vst [vmem:[#allocation2 + $0x20] sm:$0xff] %v908_v21 }
 0x1b9   : > { %v816_v38 = vpop.f32.mrf.mxu2  ;;  %v881_v6 = vpop.f32.mrf.mxu3 }
 0x1ba   : > { %v882_v25 = vadd.f32 %v881_v6, %v816_v38 }
 0x1bc   : > { %v909_v3 = vadd.f32 %v882_v25, %v699_v58 }
 0x1be   : > { %925 = vst [vmem:[#allocation2 + $0x10] sm:$0xff] %v909_v3 }
 0x1c1   : > { %v819_v61 = vpop.f32.mrf.mxu2  ;;  %v884_v39 = vpop.f32.mrf.mxu3 }
 0x1c2   : > { %v885_v43 = vadd.f32 %v884_v39, %v819_v61 }
 0x1c4   : > { %v910_v46 = vadd.f32 %v885_v43, %v700_v15 }
 0x1c6   : > { %926 = vst [vmem:[#allocation2 + $0x38] sm:$0xff] %v910_v46 }
 0x1c9   : > { %v822_v48 = vpop.f32.mrf.mxu2  ;;  %v887_v29 = vpop.f32.mrf.mxu3 }
 0x1ca   : > { %v888_v9 = vadd.f32 %v887_v29, %v822_v48 }
 0x1cc   : > { %v911_v50 = vadd.f32 %v888_v9, %v701_v28 }
 0x1ce   : > { %927 = vst [vmem:[#allocation2 + $0x60] sm:$0xff] %v911_v50 }
 0x1d1   : > { %v825_v51 = vpop.f32.mrf.mxu2  ;;  %v890_v41 = vpop.f32.mrf.mxu3 }
 0x1d2   : > { %v891_v44 = vadd.f32 %v890_v41, %v825_v51 }
 0x1d4   : > { %v912_v54 = vadd.f32 %v891_v44, %v702_v53 }
 0x1d6   : > { %928 = vst [vmem:[#allocation2 + $0x70] sm:$0xff] %v912_v54 }
 0x1d9   : > { %v828_v59 = vpop.f32.mrf.mxu2  ;;  %v893_v62 = vpop.f32.mrf.mxu3 }
 0x1da   : > { %v894_v63 = vadd.f32 %v893_v62, %v828_v59 }
 0x1dc   : > { %v913_v7 = vadd.f32 %v894_v63, %v703_v60 }
 0x1de   : > { %929 = vst [vmem:[#allocation2 + $0x78] sm:$0xff] %v913_v7 }
 0x1e1   : > { %v831_v42 = vpop.f32.mrf.mxu2  ;;  %v896_v14 = vpop.f32.mrf.mxu3 }
 0x1e2   : > { %v897_v16 = vadd.f32 %v896_v14, %v831_v42  ;;  %934 = sbr.rel (%p1193_p10) target bundleno = 507 (0x1fb), region = 40 }
 0x1e4   : > { %v914_v17 = vadd.f32 %v897_v16, %v704_v45 }
 0x1e6   : > { %930 = vst [vmem:[#allocation2 + $0x28] sm:$0xff] %v914_v17 }
 0x1e7   : > { %v935_v23 = vld [vmem:[#allocation2 + $0x30] sm:$0xff]  ;;  %v936_v26 = vld [vmem:[#allocation2] sm:$0xff]  ;;  %v937_v27 = vld [vmem:[#allocation2 + $0x58] sm:$0xff] }
 0x1e8   : > { %951 = vst [vmem:[%s1521_s24] sm:$0xff] %v935_v23  ;;  %v938_v32 = vld [vmem:[#allocation2 + $0x18] sm:$0xff]  ;;  %v939_v33 = vld [vmem:[#allocation2 + $0x50] sm:$0xff]  ;;  %v940_v35 = vld [vmem:[#allocation2 + $0x68] sm:$0xff] }
 0x1e9   : > { %952 = vst [vmem:[%s1521_s24 + $0x8] sm:$0xff] %v936_v26  ;;  %v941_v36 = vld [vmem:[#allocation2 + $0x8] sm:$0xff]  ;;  %v943_v34 = vld [vmem:[#allocation2 + $0x40] sm:$0xff]  ;;  %v945_v30 = vld [vmem:[#allocation2 + $0x10] sm:$0xff] }
 0x1ea   : > { %953 = vst [vmem:[%s1521_s24 + $0x10] sm:$0xff] %v937_v27  ;;  %v942_v31 = vld [vmem:[#allocation2 + $0x48] sm:$0xff]  ;;  %v944_v49 = vld [vmem:[#allocation2 + $0x20] sm:$0xff]  ;;  %v946_v40 = vld [vmem:[#allocation2 + $0x38] sm:$0xff] }
 0x1eb   : > { %954 = vst [vmem:[%s1521_s24 + $0x18] sm:$0xff] %v938_v32  ;;  %v947_v10 = vld [vmem:[#allocation2 + $0x60] sm:$0xff]  ;;  %v948_v47 = vld [vmem:[#allocation2 + $0x70] sm:$0xff]  ;;  %v949_v52 = vld [vmem:[#allocation2 + $0x78] sm:$0xff] }
 0x1ec   : > { %955 = vst [vmem:[%s1521_s24 + $0x20] sm:$0xff] %v939_v33  ;;  %v967_v55 = vld [vmem:[#allocation3] sm:$0x1]  ;;  %v969_v56 = vld [vmem:[#allocation4] sm:$0x1] }
 0x1ed   : > { %956 = vst [vmem:[%s1521_s24 + $0x28] sm:$0xff] %v940_v35  ;;  %v950_v2 = vld [vmem:[#allocation2 + $0x28] sm:$0xff]  ;;  %v971_v57 = vld [vmem:[#allocation5] sm:$0x1] }
 0x1ee   : > { %957 = vst [vmem:[%s1521_s24 + $0x30] sm:$0xff] %v941_v36 }
 0x1ef   : > { %958 = vst [vmem:[%s1521_s24 + $0x38] sm:$0xff] %v942_v31 }
 0x1f0   : > { %959 = vst [vmem:[%s1521_s24 + $0x40] sm:$0xff] %v943_v34 }
 0x1f1   : > { %960 = vst [vmem:[%s1521_s24 + $0x48] sm:$0xff] %v944_v49 }
 0x1f2   : > { %961 = vst [vmem:[%s1521_s24 + $0x50] sm:$0xff] %v945_v30 }
 0x1f3   : > { %962 = vst [vmem:[%s1521_s24 + $0x58] sm:$0xff] %v946_v40 }
 0x1f4   : > { %963 = vst [vmem:[%s1521_s24 + $0x60] sm:$0xff] %v947_v10 }
 0x1f5   : > { %964 = vst [vmem:[%s1521_s24 + $0x68] sm:$0xff] %v948_v47 }
 0x1f6   : > { %965 = vst [vmem:[%s1521_s24 + $0x70] sm:$0xff] %v949_v52 }
 0x1f7   : > { %966 = vst [vmem:[%s1521_s24 + $0x78] sm:$0xff] %v950_v2 }
 0x1f8   : > { %968 = vst [vmem:[%s396_s11] sm:$0x1] %v967_v55 }
 0x1f9   : > { %970 = vst [vmem:[%s399_s16] sm:$0x1] %v969_v56 }
 0x1fa   : > { %972 = vst [vmem:[%s402_s13] sm:$0x1] %v971_v57 }
 0x1fb PF: > { %s19_s30 = sadd.s32 1, %s1420_s30   ;;  %s2332_s22 = sld [smem:[#allocation8_spill]] }
 0x1fc   : > { %p16_p11 = scmp.ge.s32.totalorder %s19_s30, 6   ;;  %s2333_s23 = sld [smem:[#allocation9_spill]] }
 0x1fd   : > { %s2334_s26 = smov %s1412_s28  ;;  %s2335_s27 = smov %s1416_s29 }
 0x1fe   :  { %18 = sbr.rel (!%p16_p11) target bundleno = 4 (0x4), region = 112 }
 0x201   : > { %s2336_s28 = smov %s2332_s22 }
 0x202   : > { %s2337_s29 = smov %s2333_s23 }

</bundles_post_ra>
